<compile_context>
chip_gen: v7x
topology: tpu7x:2x2x1
jax: 0.10.0
libtpu: 0.0.40
codegen_flags: <defaults>
</compile_context>

<pallas_src>
import jax
import jax.numpy as jnp
from jax.experimental import pallas as pl
from jax.experimental.pallas import tpu as pltpu


def basicnet_kernel(x_ref, w1_ref, b1_ref, w2_ref, b2_ref, out_ref):
    # fc1: x arrives as f32 and is cast to bf16 here (VPU has slack; avoids a
    # separate XLA astype pass over x in HBM). f32 MXU accumulation.
    x = x_ref[...].astype(jnp.bfloat16)
    h = jnp.dot(x, w1_ref[...], preferred_element_type=jnp.float32)
    h = jnp.maximum(h + b1_ref[...], 0.0)
    # fc2: activations back to bf16 for the MXU, f32 accumulation + bias add,
    # final store in out_ref.dtype (bf16 by default -> half the output bytes).
    out = jnp.dot(h.astype(jnp.bfloat16), w2_ref[...],
                  preferred_element_type=jnp.float32)
    out_ref[...] = (out + b2_ref[...]).astype(out_ref.dtype)


def _round_up(x, m):
    return ((x + m - 1) // m) * m


def _choose_tb(b, tb_max):
    # Keep >= 2 grid steps whenever the batch allows it (v7x: two TensorCores
    # share the "parallel" axis), capped at tb_max, sublane-aligned (mult of 8).
    return max(8, min(tb_max, _round_up(pl.cdiv(b, 2), 8)))


def _cost(b, in_f, h_f, c_pad, out_dtype):
    flops = 2 * b * (in_f * h_f + h_f * c_pad)
    bytes_accessed = (
        b * in_f * 4                                    # x (f32, cast in-kernel)
        + in_f * h_f * 2                                # w1 (bf16)
        + h_f * 4                                       # b1 (f32)
        + h_f * c_pad * 2                               # w2 (bf16)
        + c_pad * 4                                     # b2 (f32)
        + b * c_pad * jnp.dtype(out_dtype).itemsize)    # out
    return pl.CostEstimate(flops=flops, transcendentals=0,
                           bytes_accessed=bytes_accessed)


def prepare_params(w1, b1, w2, b2):
    """One-time parameter prep (hoisted out of the hot path).

    w1: [In, H], b1: [H] or [1, H], w2: [H, C], b2: [C] or [1, C].
    Pads num_classes up to a multiple of 128 (lane-dense output store) and
    stores bf16 weights / f32 biases. Padded logit columns are exact zeros.
    """
    C = int(w2.shape[1])
    C_pad = max(128, _round_up(C, 128))
    b1 = jnp.asarray(b1, jnp.float32).reshape(1, -1)
    b2 = jnp.asarray(b2, jnp.float32).reshape(1, -1)
    if C_pad != C:
        w2 = jnp.pad(w2, ((0, 0), (0, C_pad - C)))   # zero cols -> zero logits
        b2 = jnp.pad(b2, ((0, 0), (0, C_pad - C)))
    return {
        "w1": jnp.asarray(w1, jnp.bfloat16),
        "b1": b1,
        "w2": jnp.asarray(w2, jnp.bfloat16),
        "b2": b2,
        "num_classes": C,
    }


def basicnet_forward_padded(x, params, *, tb_max=1024, out_dtype=jnp.bfloat16):
    """Returns padded [B, C_pad] logits (columns >= num_classes are zero).

    Consumers that can restrict softmax/argmax to the first num_classes
    columns should use this directly and skip the un-pad slice entirely.
    """
    B, In = x.shape
    w1, b1 = params["w1"], params["b1"]
    w2, b2 = params["w2"], params["b2"]
    H = w1.shape[1]
    C_pad = w2.shape[1]

    if B < 16:
        # Tiny batch: grid-less call, every operand is one whole-array VMEM block.
        return pl.pallas_call(
            basicnet_kernel,
            out_shape=jax.ShapeDtypeStruct((B, C_pad), out_dtype),
            in_specs=[pl.BlockSpec(memory_space=pltpu.MemorySpace.VMEM)] * 5,
            out_specs=pl.BlockSpec(memory_space=pltpu.MemorySpace.VMEM),
            cost_estimate=_cost(B, In, H, C_pad, out_dtype),
        )(x, w1, b1, w2, b2)

    # Batch-tiled path: stream x/out through the pipeline; the (tiny) weights
    # and biases stay VMEM-resident across the whole grid via constant
    # index_maps. No wrapper-side padding of x -- Pallas handles the ragged
    # last block (garbage rows are dropped on write; no batch reduction here).
    tb = _choose_tb(B, tb_max)
    n_tiles = pl.cdiv(B, tb)
    return pl.pallas_call(
        basicnet_kernel,
        out_shape=jax.ShapeDtypeStruct((B, C_pad), out_dtype),
        grid=(n_tiles,),
        in_specs=[
            pl.BlockSpec((tb, In), lambda i: (i, 0)),
            pl.BlockSpec((In, H), lambda i: (0, 0)),
            pl.BlockSpec((1, H), lambda i: (0, 0)),
            pl.BlockSpec((H, C_pad), lambda i: (0, 0)),
            pl.BlockSpec((1, C_pad), lambda i: (0, 0)),
        ],
        out_specs=pl.BlockSpec((tb, C_pad), lambda i: (i, 0)),
        compiler_params=pltpu.CompilerParams(
            dimension_semantics=("parallel",)),
        cost_estimate=_cost(B, In, H, C_pad, out_dtype),
    )(x, w1, b1, w2, b2)


def basicnet_forward(x, params, *, tb_max=1024, out_dtype=jnp.bfloat16):
    """[B, num_classes] logits.

    Call this inside the consumer's jit region so the un-pad slice fuses with
    whatever reads the logits instead of becoming a standalone copy pass.
    """
    out = basicnet_forward_padded(x, params, tb_max=tb_max, out_dtype=out_dtype)
    return out[:, :params["num_classes"]]


if __name__ == "__main__":
    input_size, hidden_size, num_classes = 32, 64, 10

    key = jax.random.PRNGKey(0)
    kx, kw1, kb1, kw2, kb2 = jax.random.split(key, 5)

    # PyTorch-style uniform init bounds 1/sqrt(fan_in); weights stored as
    # [in, out] so the kernel computes x @ W + b (== x @ W_pt.T + b).
    bound1 = 1.0 / jnp.sqrt(jnp.float32(input_size))
    w1 = jax.random.uniform(kw1, (input_size, hidden_size), jnp.float32, -bound1, bound1)
    b1 = jax.random.uniform(kb1, (1, hidden_size), jnp.float32, -bound1, bound1)
    bound2 = 1.0 / jnp.sqrt(jnp.float32(hidden_size))
    w2 = jax.random.uniform(kw2, (hidden_size, num_classes), jnp.float32, -bound2, bound2)
    b2 = jax.random.uniform(kb2, (1, num_classes), jnp.float32, -bound2, bound2)

    # One-time prep: padded bf16 weights / f32 biases (off the hot path).
    params = prepare_params(w1, b1, w2, b2)

    @jax.jit
    def fwd(x):
        # Slice lives in the same jit region as the pallas_call so a real
        # consumer would fuse with it.
        return basicnet_forward(x, params)

    def ref_fn(x):
        # Reference emulating the kernel's bf16 operand rounding (f32 accumulate).
        xb = x.astype(jnp.bfloat16).astype(jnp.float32)
        w1b = w1.astype(jnp.bfloat16).astype(jnp.float32)
        w2b = w2.astype(jnp.bfloat16).astype(jnp.float32)
        h = jnp.maximum(xb @ w1b + b1, 0.0)
        hb = h.astype(jnp.bfloat16).astype(jnp.float32)
        return hb @ w2b + b2

    # Exercise both paths: grid-less tiny batch, and the batch-tiled grid with
    # a ragged last block (300 -> tb=152, 2 "parallel" grid steps).
    for batch in (4, 300):
        x = jax.random.normal(jax.random.fold_in(kx, batch),
                              (batch, input_size), dtype=jnp.float32)
        out = jax.block_until_ready(fwd(x))
        assert out.shape == (batch, num_classes)
        ref = ref_fn(x)
        err = float(jnp.max(jnp.abs(out.astype(jnp.float32) - ref)))
        assert jnp.allclose(out.astype(jnp.float32), ref, atol=2e-2, rtol=2e-2), (
            "max abs err", err)

    print("KERNEL_OK")
</pallas_src>

<mosaic_0001>
module attributes {stable_mosaic.version = 11 : i64} {
  func.func @basicnet_kernel(%arg0: memref<4x32xf32, #tpu.memory_space<vmem>>, %arg1: memref<32x64xbf16, #tpu.memory_space<vmem>>, %arg2: memref<1x64xf32, #tpu.memory_space<vmem>>, %arg3: memref<64x128xbf16, #tpu.memory_space<vmem>>, %arg4: memref<1x128xf32, #tpu.memory_space<vmem>>, %arg5: memref<4x128xbf16, #tpu.memory_space<vmem>>) attributes {dimension_semantics = [], scalar_prefetch = 0 : i64, scratch_operands = 0 : i64, tpu.core_type = #tpu.core_type<tc>} {
    %c0 = arith.constant 0 : index
    %c0_0 = arith.constant 0 : index
    %0 = vector.load %arg0[%c0, %c0_0] : memref<4x32xf32, #tpu.memory_space<vmem>>, vector<4x32xf32>
    %1 = arith.truncf %0 : vector<4x32xf32> to vector<4x32xbf16>
    %c0_1 = arith.constant 0 : index
    %c0_2 = arith.constant 0 : index
    %2 = vector.load %arg1[%c0_1, %c0_2] : memref<32x64xbf16, #tpu.memory_space<vmem>>, vector<32x64xbf16>
    %cst = arith.constant dense<0.000000e+00> : vector<4x64xf32>
    %3 = tpu.matmul %1, %2, %cst {dimension_numbers = #tpu.dot_dimension_numbers<[1], [0], [0], [1], [0, 0, 1, 1], [], []>} : vector<4x32xbf16>, vector<32x64xbf16>, vector<4x64xf32> -> vector<4x64xf32>
    %c0_3 = arith.constant 0 : index
    %c0_4 = arith.constant 0 : index
    %4 = vector.load %arg2[%c0_3, %c0_4] : memref<1x64xf32, #tpu.memory_space<vmem>>, vector<1x64xf32>
    %5 = vector.broadcast %4 : vector<1x64xf32> to vector<4x64xf32>
    %6 = arith.addf %3, %5 : vector<4x64xf32>
    %cst_5 = arith.constant 0.000000e+00 : f32
    %7 = vector.broadcast %cst_5 : f32 to vector<4x64xf32>
    %8 = arith.maximumf %6, %7 : vector<4x64xf32>
    %9 = arith.truncf %8 : vector<4x64xf32> to vector<4x64xbf16>
    %c0_6 = arith.constant 0 : index
    %c0_7 = arith.constant 0 : index
    %10 = vector.load %arg3[%c0_6, %c0_7] : memref<64x128xbf16, #tpu.memory_space<vmem>>, vector<64x128xbf16>
    %cst_8 = arith.constant dense<0.000000e+00> : vector<4x128xf32>
    %11 = tpu.matmul %9, %10, %cst_8 {dimension_numbers = #tpu.dot_dimension_numbers<[1], [0], [0], [1], [0, 0, 1, 1], [], []>} : vector<4x64xbf16>, vector<64x128xbf16>, vector<4x128xf32> -> vector<4x128xf32>
    %c0_9 = arith.constant 0 : index
    %c0_10 = arith.constant 0 : index
    %12 = vector.load %arg4[%c0_9, %c0_10] : memref<1x128xf32, #tpu.memory_space<vmem>>, vector<1x128xf32>
    %13 = vector.broadcast %12 : vector<1x128xf32> to vector<4x128xf32>
    %14 = arith.addf %11, %13 : vector<4x128xf32>
    %15 = arith.truncf %14 : vector<4x128xf32> to vector<4x128xbf16>
    %c0_11 = arith.constant 0 : index
    %c0_12 = arith.constant 0 : index
    %16 = vector.load %arg5[%c0_11, %c0_12] : memref<4x128xbf16, #tpu.memory_space<vmem>>, vector<4x128xbf16>
    tpu.vector_store %arg5[%c0_11, %c0_12], %15 {strides = array<i32>} : memref<4x128xbf16, #tpu.memory_space<vmem>>, vector<4x128xbf16>,
    return
  }
}

</mosaic_0001>

<bundles_post_ra>
// kernel: fwd.1
= control target key start
LH: loop header
LB: loop body
LE: loop exit
PB: predicated region body
PF: predicated region fallthrough
CT: control target
= control target key end

     0   :  { %10 = vsyncpa [#allocation3], 0  ;;  %s435_s0 = inlined_call_operand.hbm [shape: f32[4,32], index: 0, kind: input, shape index: {}]   ;;  %s436_s1 = inlined_call_operand.vmem [shape: bf16[32,64], index: 1, kind: input, shape index: {}]   ;;  %s437_s2 = inlined_call_operand.vmem [shape: f32[1,64], index: 2, kind: input, shape index: {}]   ;;  %s438_s3 = inlined_call_operand.hbm [shape: bf16[64,128], index: 3, kind: input, shape index: {}]   ;;  %s439_s4 = inlined_call_operand.vmem [shape: f32[1,128], index: 4, kind: input, shape index: {}]   ;;  %s440_s5 = inlined_call_operand.hbm [shape: bf16[4,128], index: 5, kind: output, shape index: {}]  }
   0x1   :  { %11 = vsyncpa [#allocation6], 0 }
   0x2   :  { %12 = vsyncpa [#allocation4], 0  ;;  %s343_s18 = smov [#allocation2]   ;;  %s344_s20 = smov [#allocation5]  }
   0x3   :  { %s19_s19 = sshll.u32 %s343_s18, 4  ;;  %s32_s21 = sshll.u32 %s344_s20, 4  ;;  %s20_s19 = int_to_ptr.vmem [resolvable:$true] %s19_s19  ;;  %s380_s21 = int_to_ptr.vmem [resolvable:$true] %s32_s21 }
   0x4   :  { %s271_s24 = scalar_lea.hbm %s435_s0, 64 }
   0x5   :  { %p272_p0 = scmp.ne.s32.totalorder %s435_s0, %s271_s24  ;;  %p275_p1 = scmp.lt.u32.totalorder %s271_s24, %s435_s0 }
   0x7   :  { %p277_p2 = pnand %p275_p1, %p272_p0 }
   0x9   :  { %280 = shalt.err (!%p277_p2)
}
   0xa   :  { %s281_s29 = scalar_lea.vmem %s20_s19, 64  ;;  %p286_p4 = scmp.lt.s32.totalorder %s20_s19, %s20_s19 }
   0xb   :  { %p282_p3 = scmp.ne.s32.totalorder %s20_s19, %s281_s29  ;;  %p287_p5 = scmp.lt.s32.totalorder %s281_s29, %s281_s29 }
   0xd   :  { %p288_p6 = por %p287_p5, %p286_p4 }
   0xf   :  { %p289_p7 = pnand %p288_p6, %p282_p3 }
  0x11   :  { %292 = shalt.err (!%p289_p7)
}
  0x12   :  { %22 = dma.hbm_to_vmem [thread:$0]  %s435_s0, 64, %s20_s19, [#allocation3]  }
  0x13   :  { %s293_s9 = scalar_lea.hbm %s438_s3, 512 }
  0x14   :  { %p294_p8 = scmp.ne.s32.totalorder %s438_s3, %s293_s9  ;;  %p297_p9 = scmp.lt.u32.totalorder %s293_s9, %s438_s3 }
  0x16   :  { %p299_p10 = pnand %p297_p9, %p294_p8 }
  0x18   :  { %302 = shalt.err (!%p299_p10)
}
  0x19   :  { %s303_s14 = scalar_lea.vmem %s380_s21, 512  ;;  %p308_p12 = scmp.lt.s32.totalorder %s380_s21, %s380_s21 }
  0x1a   :  { %p304_p11 = scmp.ne.s32.totalorder %s380_s21, %s303_s14  ;;  %p309_p13 = scmp.lt.s32.totalorder %s303_s14, %s303_s14 }
  0x1c   :  { %p310_p0 = por %p309_p13, %p308_p12 }
  0x1e   :  { %p311_p1 = pnand %p310_p0, %p304_p11 }
  0x20   :  { %314 = shalt.err (!%p311_p1)
}
  0x21   :  { %s345_s0 = smov 64   ;;  %s346_s15 = smov 4  }
  0x22   :  { %38 = dma.hbm_to_vmem [thread:$0]  %s438_s3, 512, %s380_s21, [#allocation6], %s345_s0, %s345_s0, %s346_s15  }
  0x23   :  { %337 = dma.done.wait [#allocation3], 64  }
  0x24   :  { %338 = vsyncadd [#allocation3], 4294967232 }
  0x25   :  { %339 = dma.done.wait [#allocation6], 512  }
  0x26   :  { %340 = vsyncadd [#allocation6], 4294966784  ;;  %v347_v0 = vmov 0.0   ;;  %vm348_vm0 = vmmov 0   ;;  %v265_v1 = vld [vmem:[%s436_s1] sm:$0xff]   ;;  %v266_v2 = vld [vmem:[%s436_s1 + $0x8] sm:$0xff]  }
  0x27   :  { %238 = vmatprep.subr.bf16.mxu0 %v347_v0  ;;  %242 = vmatprep.mubr.msk.bf16.mxu0 %vm348_vm0, %v347_v0  ;;  %v48_v3 = vld [vmem:[#allocation2] sm:$0xf]  ;;  %v267_v4 = vld [vmem:[#allocation5] sm:$0xff]   ;;  %v268_v5 = vld [vmem:[#allocation5 + $0x8] sm:$0xff]   ;;  %vm73_vm1 = vcmask 261120   ;;  %vm158_vm2 = vcmask 523264  }
  0x28   :  { %246 = vmatprep.subr.bf16.mxu1 %v347_v0  ;;  %254 = vmatprep.mubr.msk.bf16.mxu1 %vm348_vm0, %v347_v0  ;;  %v49_v6 = vpack.c.bf16 %v48_v3, %v48_v3  ;;  %v269_v7 = vld [vmem:[#allocation5 + $0x10] sm:$0xff]   ;;  %v270_v8 = vld [vmem:[#allocation5 + $0x18] sm:$0xff]   ;;  %s349_s24 = smov [#allocation7]  }
  0x29   :  { %239 = vmatpush3.bf16.msra.mxu0 %v265_v1  ;;  %247 = vmatpush3.bf16.msra.mxu1 %v267_v4  ;;  %v220_v9 = vld [vmem:[%s437_s2] ss:$0 sm:$0xff]  ;;  %s210_s25 = sshll.u32 %s349_s24, 4  ;;  %s211_s25 = int_to_ptr.vmem [resolvable:$true] %s210_s25 }
  0x2a   :  { %240 = vmatprep.subr.bf16.mxu0 %v347_v0  ;;  %248 = vmatprep.subr.bf16.mxu1 %v347_v0  ;;  %v224_v17 = vld [vmem:[%s439_s4] ss:$0 sm:$0xff]  ;;  %s315_s2 = scalar_lea.vmem %s211_s25, 32  ;;  %p320_p3 = scmp.lt.s32.totalorder %s211_s25, %s211_s25 }
  0x2b   :  { %p316_p2 = scmp.ne.s32.totalorder %s211_s25, %s315_s2  ;;  %p321_p4 = scmp.lt.s32.totalorder %s315_s2, %s315_s2 }
  0x2d   :  { %241 = vmatpush3.bf16.msra.mxu0 %v266_v2  ;;  %249 = vmatpush3.bf16.msra.mxu1 %v268_v5  ;;  %p322_p5 = por %p321_p4, %p320_p3 }
  0x2e   :  { %250 = vmatprep.subr.bf16.mxu1 %v347_v0 }
  0x2f   :  { %p323_p6 = pnand %p322_p5, %p316_p2 }
  0x30   :  { %243 = vmatmul.mubr.msk.bf16.vlgmr.msra.gmra.mrb[0].mxu0 %vm73_vm1, %v49_v6 }
  0x31   :  { %251 = vmatpush3.bf16.msra.mxu1 %v269_v7 }
  0x32   :  { %252 = vmatprep.subr.bf16.mxu1 %v347_v0 }
  0x35   :  { %253 = vmatpush3.bf16.msra.mxu1 %v270_v8 }
 0x103   :  { %v111_v10 = vpop.f32.mrb[0].mxu0 }
 0x104   :  { %v112_v11 = vadd.f32 %v220_v9, %v111_v10  ;;  %v244_v12 = vpop.f32.mrb[1].mxu0 }
 0x105   :  { %v114_v13 = vpop.f32.mrb[2].mxu0 }
 0x106   :  { %v117_v14 = vmax.f32 %v112_v11, 0.0  ;;  %v245_v15 = vpop.f32.mrb[3].mxu0 }
 0x108   :  { %v118_v16 = vpack.c.bf16 %v117_v14, %v117_v14 }
 0x10a   :  { %255 = vmatmul.mubr.msk.bf16.vlgmr.msra.gmra.mrb[0].mxu1 %vm158_vm2, %v118_v16 }
 0x1dd   :  { %v196_v18 = vpop.f32.mrb[0].mxu1 }
 0x1de   :  { %v197_v19 = vadd.f32 %v224_v17, %v196_v18  ;;  %v256_v20 = vpop.f32.mrb[1].mxu1 }
 0x1df   :  { %v199_v21 = vpop.f32.mrb[2].mxu1 }
 0x1e0   :  { %v202_v22 = vpack.c.bf16 %v197_v19, %v197_v19  ;;  %v257_v23 = vpop.f32.mrb[3].mxu1 }
 0x1e2   :  { %203 = vst [vmem:[#allocation7] sm:$0x3] %v202_v22 }
 0x1e3   :  { %326 = shalt.err (!%p323_p6)
}
 0x1e4   :  { %s327_s4 = scalar_lea.hbm %s440_s5, 32 }
 0x1e5   :  { %p328_p7 = scmp.ne.s32.totalorder %s440_s5, %s327_s4  ;;  %p331_p8 = scmp.lt.u32.totalorder %s327_s4, %s440_s5 }
 0x1e7   :  { %p333_p9 = pnand %p331_p8, %p328_p7 }
 0x1e9   :  { %336 = shalt.err (!%p333_p9)
}
 0x1ea   :  { %213 = dma.vmem_to_hbm [thread:$0]  %s211_s25, 32, %s440_s5, [#allocation4]  }
 0x1eb   :  { %341 = dma.done.wait [#allocation4], 32  }
 0x1ec   :  { %342 = vsyncadd [#allocation4], 4294967264 }
 0x1ed   :  { %217 = vsyncpa [#allocation3], 1 }
 0x1ee   :  { %218 = vsyncpa [#allocation6], 1 }
 0x1ef   :  { %219 = vsyncpa [#allocation4], 1 }

</bundles_post_ra>
